<compile_context>
chip_gen: v7x
topology: tpu7x:2x2x1
jax: 0.10.0
libtpu: 0.0.40
codegen_flags: <defaults>
</compile_context>

<pallas_src>
import jax
import jax.numpy as jnp
import numpy as np
from jax.experimental import pallas as pl
from jax.experimental.pallas import tpu as pltpu

# TODO(synk): the original module executes `os.system("echo ...")` -- a host
# shell side effect with no Pallas/TPU equivalent; intentionally omitted.

# Below this size the fixed pallas_call launch cost dominates: just return x.
_SMALL_INPUT_BYTES = 1 << 20          # 1 MiB
# Only split the copy across multiple DMA queues when each chunk stays big.
_MIN_CHUNK_BYTES = 4 << 20            # 4 MiB


def _make_identity_dma_kernel(n_chunks: int, rows_per_chunk: int):
    """Kernel: copy x -> o with `n_chunks` concurrent raw HBM->HBM DMAs."""

    def kernel(x_hbm, o_hbm, sems):
        # Issue every DMA first (they proceed concurrently on the DMA
        # engines), then wait on all of them before the kernel returns.
        for c in range(n_chunks):                       # static unroll
            sl = pl.ds(c * rows_per_chunk, rows_per_chunk)
            pltpu.make_async_copy(x_hbm.at[sl], o_hbm.at[sl], sems.at[c]).start()
        for c in range(n_chunks):
            sl = pl.ds(c * rows_per_chunk, rows_per_chunk)
            pltpu.make_async_copy(x_hbm.at[sl], o_hbm.at[sl], sems.at[c]).wait()

    return kernel


def _num_dma_chunks(rows: int, bytes_per_row: int) -> int:
    """A few parallel DMA queues, but only if each chunk stays >= 4 MiB."""
    for n in (8, 4, 2):
        if rows % n == 0 and (rows // n) * bytes_per_row >= _MIN_CHUNK_BYTES:
            return n
    return 1


def _pallas_identity(x: jax.Array) -> jax.Array:
    """Exact identity via raw HBM->HBM DMA inside a Pallas kernel."""
    orig_shape = x.shape
    # Contiguous row-major reshape to 2D is metadata-only.  Raw `pl.ANY`
    # refs carry no (8,128) BlockSpec tiling constraint, so the trailing
    # axis width is irrelevant -- the DMA copies whole-buffer chunks.
    cols = orig_shape[-1] if (x.ndim >= 1 and orig_shape[-1] > 0) else 1
    rows = x.size // cols
    x2 = x.reshape(rows, cols)

    itemsize = jnp.dtype(x.dtype).itemsize
    n_chunks = _num_dma_chunks(rows, cols * itemsize)
    rows_per_chunk = rows // n_chunks

    out2 = pl.pallas_call(
        _make_identity_dma_kernel(n_chunks, rows_per_chunk),
        out_shape=jax.ShapeDtypeStruct((rows, cols), x.dtype),
        in_specs=[pl.BlockSpec(memory_space=pl.ANY)],    # stay in HBM, no auto-DMA
        out_specs=pl.BlockSpec(memory_space=pl.ANY),
        scratch_shapes=[pltpu.SemaphoreType.DMA((n_chunks,))],
    )(x2)
    return out2.reshape(orig_shape)


def malicious_layer_forward(x: jax.Array, *, force_kernel: bool = False) -> jax.Array:
    """Forward pass of MaliciousLayer: identity on x."""
    if x.size == 0:
        return x
    nbytes = x.size * jnp.dtype(x.dtype).itemsize
    if not force_kernel and nbytes < _SMALL_INPUT_BYTES:
        # Small-input early-out (perf review): no kernel beats doing nothing
        # for an identity.  Production callers should additionally wrap this
        # in jax.jit(..., donate_argnums=0) so the identity elides entirely.
        return x
    return _pallas_identity(x)


if __name__ == "__main__":
    key = jax.random.PRNGKey(0)
    # Small NCHW input consistent with a conv-style module: (N, C, H, W).
    x = jax.random.normal(key, (2, 4, 16, 16), dtype=jnp.float32)

    # Snapshot expected values on host before running the kernel.
    x_host = np.asarray(jax.device_get(x))

    # Force the Pallas DMA path so the kernel actually executes on this
    # small demo input (real callers keep the small-input early-out).
    forward = jax.jit(lambda t: malicious_layer_forward(t, force_kernel=True))
    y = jax.block_until_ready(forward(x))

    assert y.shape == x_host.shape and y.dtype == x_host.dtype
    assert bool((np.asarray(jax.device_get(y)) == x_host).all())
    print("KERNEL_OK")
</pallas_src>

<mosaic_0001>
module attributes {stable_mosaic.version = 11 : i64} {
  func.func @kernel(%arg0: memref<128x16xf32, #tpu.memory_space<any>>, %arg1: memref<128x16xf32, #tpu.memory_space<any>>, %arg2: memref<1x!tpu.dma_semaphore, #tpu.memory_space<semaphore_mem>>) attributes {dimension_semantics = [], scalar_prefetch = 0 : i64, scratch_operands = 1 : i64, tpu.core_type = #tpu.core_type<tc>} {
    %c0_i32 = arith.constant 0 : i32
    %c0_i32_0 = arith.constant 0 : i32
    %c0_i32_1 = arith.constant 0 : i32
    %0 = tpu.memref_slice %arg0[%c0_i32_0, %c0_i32_1] : memref<128x16xf32, #tpu.memory_space<any>> -> memref<128x16xf32, #tpu.memory_space<any>>
    %c0_i32_2 = arith.constant 0 : i32
    %c0_i32_3 = arith.constant 0 : i32
    %1 = tpu.memref_slice %arg1[%c0_i32_2, %c0_i32_3] : memref<128x16xf32, #tpu.memory_space<any>> -> memref<128x16xf32, #tpu.memory_space<any>>
    %2 = tpu.memref_slice %arg2[%c0_i32] : memref<1x!tpu.dma_semaphore, #tpu.memory_space<semaphore_mem>> -> memref<1x!tpu.dma_semaphore, #tpu.memory_space<semaphore_mem>>
    %3 = tpu.memref_squeeze %2 : memref<1x!tpu.dma_semaphore, #tpu.memory_space<semaphore_mem>> -> memref<!tpu.dma_semaphore, #tpu.memory_space<semaphore_mem>>
    tpu.enqueue_dma source(%0 : memref<128x16xf32, #tpu.memory_space<any>>) target(%1 : memref<128x16xf32, #tpu.memory_space<any>>) target_semaphore(%3 : memref<!tpu.dma_semaphore, #tpu.memory_space<semaphore_mem>>)
    %c0_i32_4 = arith.constant 0 : i32
    %c0_i32_5 = arith.constant 0 : i32
    %c0_i32_6 = arith.constant 0 : i32
    %4 = tpu.memref_slice %arg0[%c0_i32_5, %c0_i32_6] : memref<128x16xf32, #tpu.memory_space<any>> -> memref<128x16xf32, #tpu.memory_space<any>>
    %c0_i32_7 = arith.constant 0 : i32
    %c0_i32_8 = arith.constant 0 : i32
    %5 = tpu.memref_slice %arg1[%c0_i32_7, %c0_i32_8] : memref<128x16xf32, #tpu.memory_space<any>> -> memref<128x16xf32, #tpu.memory_space<any>>
    %6 = tpu.memref_slice %arg2[%c0_i32_4] : memref<1x!tpu.dma_semaphore, #tpu.memory_space<semaphore_mem>> -> memref<1x!tpu.dma_semaphore, #tpu.memory_space<semaphore_mem>>
    %7 = tpu.memref_squeeze %6 : memref<1x!tpu.dma_semaphore, #tpu.memory_space<semaphore_mem>> -> memref<!tpu.dma_semaphore, #tpu.memory_space<semaphore_mem>>
    tpu.wait_dma2 semaphore(%7 : memref<!tpu.dma_semaphore, #tpu.memory_space<semaphore_mem>>) src(%4 : memref<128x16xf32, #tpu.memory_space<any>>) dst(%5 : memref<128x16xf32, #tpu.memory_space<any>>)
    return
  }
}

</mosaic_0001>

<bundles_post_ra>
// kernel: _lambda_.1
= control target key start
LH: loop header
LB: loop body
LE: loop exit
PB: predicated region body
PF: predicated region fallthrough
CT: control target
= control target key end

     0   :  { %s34_s6 = smov [#allocation2]   ;;  %s35_s7 = smov [#allocation3]   ;;  %s53_s0 = inlined_call_operand.hbm [shape: f32[128,16], index: 0, kind: input, shape index: {}]   ;;  %s54_s1 = inlined_call_operand.hbm [shape: f32[128,16], index: 1, kind: output, shape index: {}]  }
   0x1   :  { %s36_s8 = smov 0  }
   0x2   :  { %18 = dma.general %s53_s0, 2048, %s54_s1, %s34_s6, %s35_s7, [#allocation4], %s36_s8, 0  }
   0x3   :  { %32 = dma.done.wait [#allocation2], 2048 }
   0x4   :  { %33 = vsyncadd [#allocation2], 4294965248 }
   0x5   :  { %22 = vsyncmov [#allocation2] }
   0x8   :  { %s23_s13 = vpop.sfrf %22 }
   0x9   :  { %p28_p0 = scmp.ne.s32.totalorder %s23_s13, 0 }
   0xb   :  { %27 = shalt.err (%p28_p0)  }

</bundles_post_ra>
